<compile_context>
chip_gen: v7x
topology: tpu7x:2x2x1
jax: 0.10.0
libtpu: 0.0.40
codegen_flags: <defaults>
</compile_context>

<pallas_src>
import math

import numpy as np
import jax
import jax.numpy as jnp
from jax.experimental import pallas as pl
from jax.experimental.pallas import tpu as pltpu

# Standardization constants (module-level globals in the original code; chosen
# deterministically here — roughly continental-US coordinate statistics).
# NOTE: these must match the original module's `lat_mean/lat_std/lon_mean/lon_std`
# globals or every encoding is systematically shifted.
LAT_MEAN = 39.5
LAT_STD = 5.0
LON_MEAN = -98.35
LON_STD = 15.0


def _round_up(x: int, m: int) -> int:
    return ((x + m - 1) // m) * m


def _cdiv(a: int, b: int) -> int:
    return -(-a // b)


def _posenc_kernel(crs_t_ref, scale_ref, phase_ref, out_ref):
    """crs_t_ref: [K, TB]   (row 2p = lon of packed slot p, row 2p+1 = lat; rest zero)
       scale_ref: [K, W]    per-lane fused scale table
       phase_ref: [1, W]    per-lane fused phase (mean offset + pi/2 for cos lanes)
       out_ref  : [TB, W]
       out = sin(crs_t^T @ scale + phase)
    """
    # Transposed-lhs f32 matmul on the (otherwise idle) MXU; f32 contract
    # precision keeps the angle accurate to ~1e-7 relative.
    angle = jax.lax.dot_general(
        crs_t_ref[...], scale_ref[...],
        dimension_numbers=(((0,), (0,)), ((), ())),
        precision=jax.lax.Precision.HIGHEST,
        preferred_element_type=jnp.float32,
    )
    angle = angle + phase_ref[...]          # [1, W] sublane-broadcast add
    out_ref[...] = jnp.sin(angle).astype(out_ref.dtype)


def _build_tables(d_model: int, pack: int, k_rows: int):
    """Per-lane fused scale/phase tables: scale [k_rows, pack*d_model], phase [1, pack*d_model]."""
    F = d_model // 4
    deg2rad = math.pi / 180.0
    positions = np.arange(F, dtype=np.float64)
    freqs = 1.0 / (10000.0 ** (2.0 * positions / d_model))          # [F]

    # Column layout inside one d_model block:
    #   [0,F): sin(lat*f)  [F,2F): cos(lat*f)  [2F,3F): sin(lon*f)  [3F,4F): cos(lon*f)
    lat_scale_blk = np.concatenate(
        [freqs, freqs, np.zeros(2 * F)]) * (deg2rad / LAT_STD)
    lon_scale_blk = np.concatenate(
        [np.zeros(2 * F), freqs, freqs]) * (deg2rad / LON_STD)
    lat_off = -LAT_MEAN * deg2rad / LAT_STD * freqs
    lon_off = -LON_MEAN * deg2rad / LON_STD * freqs
    phase_blk = np.concatenate(
        [lat_off, lat_off + math.pi / 2.0, lon_off, lon_off + math.pi / 2.0])

    W = pack * d_model
    scale = np.zeros((k_rows, W), dtype=np.float64)
    phase = np.zeros((1, W), dtype=np.float64)
    for p in range(pack):
        sl = slice(p * d_model, (p + 1) * d_model)
        scale[2 * p, sl] = lon_scale_blk        # crs_t row 2p   = lon of slot p
        scale[2 * p + 1, sl] = lat_scale_blk    # crs_t row 2p+1 = lat of slot p
        phase[0, sl] = phase_blk
    return scale.astype(np.float32), phase.astype(np.float32)


def coordinate_preprocessor_positional(crs, d_model: int = 64,
                                       tile_rows: int = 8192,
                                       out_dtype=jnp.float32):
    """Pallas equivalent of CoordinatePreprocessor.forward ('positional' method).

    crs: [B, 2] with crs[:, 0] = longitude, crs[:, 1] = latitude.
    Returns `out_dtype` (default float32, matching PyTorch) array [B, d_model].
    (On v5e, passing out_dtype=jnp.bfloat16 halves HBM write traffic if the
    consumer tolerates it.)
    """
    assert d_model % 4 == 0, "d_model must be divisible by 4"
    B = crs.shape[0]

    # Lane-dense packing: `pack` batch rows per 128-wide output row.
    if d_model <= 128 and 128 % d_model == 0:
        pack = 128 // d_model
    else:
        pack = 1   # W not a multiple of 128 -> masked stores; acceptable fallback.
    W = pack * d_model
    K = _round_up(2 * pack, 8)                        # contraction rows (sublane granule)

    # ---- Tile / grid selection --------------------------------------------
    rows_needed = max(1, _cdiv(B, pack))
    if rows_needed <= 1024:
        # Tiny problem: single full-extent tile, minimal padding.
        TB = _round_up(rows_needed, 8)
        grid_len = 1
    else:
        # Even grid length so v7x's two TensorCores get balanced shards;
        # TB is a multiple of 128 (lane granule of the tiled input axis).
        grid_len = max(2, _cdiv(rows_needed, tile_rows))
        if grid_len % 2:
            grid_len += 1
        TB = _round_up(_cdiv(rows_needed, grid_len), 128)
    num_rows = grid_len * TB
    B_pad = num_rows * pack

    # ---- Inputs ------------------------------------------------------------
    crs_f32 = crs.astype(jnp.float32)
    if B_pad != B:
        crs_f32 = jnp.pad(crs_f32, ((0, B_pad - B), (0, 0)))
    # [num_rows, 2*pack] = (lon0, lat0, lon1, lat1, ...) -> transpose to lane-dense
    # [K, num_rows] so per-step DMA is one contiguous (8 x TB) block.
    crs_t = crs_f32.reshape(num_rows, 2 * pack).T
    if K != 2 * pack:
        crs_t = jnp.pad(crs_t, ((0, K - 2 * pack), (0, 0)))

    scale_np, phase_np = _build_tables(d_model, pack, K)
    scale = jnp.asarray(scale_np)                      # [K, W]
    phase = jnp.asarray(phase_np)                      # [1, W]

    cost = pl.CostEstimate(
        flops=(2 * K + 1) * num_rows * W,
        transcendentals=num_rows * W,
        bytes_accessed=4 * (K * num_rows + (K + 1) * W) + num_rows * W * jnp.dtype(out_dtype).itemsize,
    )

    out_packed = pl.pallas_call(
        _posenc_kernel,
        out_shape=jax.ShapeDtypeStruct((num_rows, W), out_dtype),
        grid=(grid_len,),
        in_specs=[
            pl.BlockSpec((K, TB), lambda i: (0, i)),   # lane-dense crs block
            pl.BlockSpec((K, W), lambda i: (0, 0)),    # scale table (resident)
            pl.BlockSpec((1, W), lambda i: (0, 0)),    # phase row   (resident)
        ],
        out_specs=pl.BlockSpec((TB, W), lambda i: (i, 0)),
        compiler_params=pltpu.CompilerParams(
            dimension_semantics=("parallel",)),
        cost_estimate=cost,
    )(crs_t, scale, phase)

    # Contiguous (free) unpack back to [B, d_model].
    return out_packed.reshape(B_pad, d_model)[:B]


def _reference(crs, d_model=64):
    # Pure-numpy reference mirroring the PyTorch code path.
    crs = np.asarray(crs, dtype=np.float64)
    lon = crs[:, 0]
    lat = crs[:, 1]
    lat = (lat - LAT_MEAN) / LAT_STD
    lon = (lon - LON_MEAN) / LON_STD
    lat_rad = np.radians(lat)[:, None]
    lon_rad = np.radians(lon)[:, None]
    positions = np.arange(d_model // 4)
    frequencies = 1 / 10000 ** (2 * positions / d_model)
    lat_enc = np.concatenate(
        [np.sin(lat_rad * frequencies), np.cos(lat_rad * frequencies)], axis=1)
    lon_enc = np.concatenate(
        [np.sin(lon_rad * frequencies), np.cos(lon_rad * frequencies)], axis=1)
    return np.concatenate([lat_enc, lon_enc], axis=1).astype(np.float32)


def _run_case(key, B, d_model):
    k_lon, k_lat = jax.random.split(key)
    lon = jax.random.uniform(k_lon, (B,), minval=-125.0, maxval=-70.0)
    lat = jax.random.uniform(k_lat, (B,), minval=25.0, maxval=49.0)
    crs = jnp.stack([lon, lat], axis=1).astype(jnp.float32)   # [B, 2] = (lon, lat)
    out = jax.block_until_ready(coordinate_preprocessor_positional(crs, d_model=d_model))
    ref = _reference(np.asarray(crs), d_model=d_model)
    np.testing.assert_allclose(np.asarray(out), ref, rtol=1e-4, atol=1e-5)


if __name__ == "__main__":
    key = jax.random.PRNGKey(0)
    k0, k1 = jax.random.split(key)
    d_model = 64  # coordinate_embedding_dim

    _run_case(k0, B=8, d_model=d_model)      # tiny: single-tile path
    _run_case(k1, B=2500, d_model=d_model)   # multi-tile (even grid) path + padding

    # TODO(synk): other config branches (embedding lookup, geoclip LocationEncoder,
    # sincos, positional_random, string-date season one-hot) are dispatch
    # alternatives not implemented here.
    print("KERNEL_OK")
</pallas_src>

<mosaic_0001>
module attributes {stable_mosaic.version = 11 : i64} {
  func.func @_posenc_kernel(%arg0: i32, %arg1: memref<8x8xf32, #tpu.memory_space<vmem>>, %arg2: memref<8x128xf32, #tpu.memory_space<vmem>>, %arg3: memref<1x128xf32, #tpu.memory_space<vmem>>, %arg4: memref<8x128xf32, #tpu.memory_space<vmem>>) attributes {dimension_semantics = [#tpu.dimension_semantics<parallel>], iteration_bounds = array<i64: 1>, scalar_prefetch = 0 : i64, scratch_operands = 0 : i64, tpu.core_type = #tpu.core_type<tc>, window_params = [{transform_indices = @transform_0, window_bounds = array<i64: 8, 8>}, {pipeline_mode = #tpu.pipeline_mode<synchronous>, transform_indices = @transform_1, window_bounds = array<i64: 8, 128>}, {pipeline_mode = #tpu.pipeline_mode<synchronous>, transform_indices = @transform_2, window_bounds = array<i64: 1, 128>}, {transform_indices = @transform_3, window_bounds = array<i64: 8, 128>}]} {
    %c0 = arith.constant 0 : index
    %c0_0 = arith.constant 0 : index
    %0 = vector.load %arg1[%c0, %c0_0] : memref<8x8xf32, #tpu.memory_space<vmem>>, vector<8x8xf32>
    %c0_1 = arith.constant 0 : index
    %c0_2 = arith.constant 0 : index
    %1 = vector.load %arg2[%c0_1, %c0_2] : memref<8x128xf32, #tpu.memory_space<vmem>>, vector<8x128xf32>
    %cst = arith.constant dense<0.000000e+00> : vector<8x128xf32>
    %2 = tpu.matmul %0, %1, %cst {dimension_numbers = #tpu.dot_dimension_numbers<[0], [0], [1], [1], [0, 1, 1, 1], [], []>, precision = #tpu.contract_precision<fp32>} : vector<8x8xf32>, vector<8x128xf32>, vector<8x128xf32> -> vector<8x128xf32>
    %c0_3 = arith.constant 0 : index
    %c0_4 = arith.constant 0 : index
    %3 = vector.load %arg3[%c0_3, %c0_4] : memref<1x128xf32, #tpu.memory_space<vmem>>, vector<1x128xf32>
    %4 = vector.broadcast %3 : vector<1x128xf32> to vector<8x128xf32>
    %5 = arith.addf %2, %4 : vector<8x128xf32>
    %6 = math.sin %5 : vector<8x128xf32>
    %c0_5 = arith.constant 0 : index
    %c0_6 = arith.constant 0 : index
    %7 = vector.load %arg4[%c0_5, %c0_6] : memref<8x128xf32, #tpu.memory_space<vmem>>, vector<8x128xf32>
    tpu.vector_store %arg4[%c0_5, %c0_6], %6 {strides = array<i32>} : memref<8x128xf32, #tpu.memory_space<vmem>>, vector<8x128xf32>,
    return
  }
  func.func @transform_0(%arg0: i32) -> (i32, i32) {
    %c0_i32 = arith.constant 0 : i32
    %c0_i32_0 = arith.constant 0 : i32
    return %c0_i32, %arg0 : i32, i32
  }
  func.func @transform_1(%arg0: i32) -> (i32, i32) {
    %c0_i32 = arith.constant 0 : i32
    %c0_i32_0 = arith.constant 0 : i32
    %c0_i32_1 = arith.constant 0 : i32
    return %c0_i32, %c0_i32_0 : i32, i32
  }
  func.func @transform_2(%arg0: i32) -> (i32, i32) {
    %c0_i32 = arith.constant 0 : i32
    %c0_i32_0 = arith.constant 0 : i32
    %c0_i32_1 = arith.constant 0 : i32
    return %c0_i32, %c0_i32_0 : i32, i32
  }
  func.func @transform_3(%arg0: i32) -> (i32, i32) {
    %c0_i32 = arith.constant 0 : i32
    %c0_i32_0 = arith.constant 0 : i32
    return %arg0, %c0_i32 : i32, i32
  }
}

</mosaic_0001>

<bundles_post_ra>
// kernel: tpu_custom_call.1
= control target key start
LH: loop header
LB: loop body
LE: loop exit
PB: predicated region body
PF: predicated region fallthrough
CT: control target
= control target key end

     0   :  { %8 = vsyncpa [#allocation3], 0  ;;  %s896_s0 = inlined_call_operand.hbm [shape: f32[8,8], index: 0, kind: input, shape index: {}]   ;;  %s897_s1 = inlined_call_operand.hbm [shape: f32[8,128], index: 1, kind: input, shape index: {}]   ;;  %s898_s2 = inlined_call_operand.vmem [shape: f32[1,128], index: 2, kind: input, shape index: {}]   ;;  %s899_s3 = inlined_call_operand.hbm [shape: f32[8,128], index: 3, kind: output, shape index: {}]  }
   0x1   :  { %9 = vsyncpa [#allocation6], 0 }
   0x2   :  { %10 = vsyncpa [#allocation4], 0  ;;  %s799_s12 = smov [#allocation2]   ;;  %s800_s14 = smov [#allocation5]  }
   0x3   :  { %s17_s13 = sshll.u32 %s799_s12, 4  ;;  %s27_s15 = sshll.u32 %s800_s14, 4  ;;  %s18_s13 = int_to_ptr.vmem [resolvable:$true] %s17_s13  ;;  %s28_s15 = int_to_ptr.vmem [resolvable:$true] %s27_s15 }
   0x4   :  { %s727_s18 = scalar_lea.hbm %s896_s0, 128 }
   0x5   :  { %p728_p0 = scmp.ne.s32.totalorder %s896_s0, %s727_s18  ;;  %p731_p1 = scmp.lt.u32.totalorder %s727_s18, %s896_s0 }
   0x7   :  { %p733_p2 = pnand %p731_p1, %p728_p0 }
   0x9   :  { %736 = shalt.err (!%p733_p2)
}
   0xa   :  { %s737_s23 = scalar_lea.vmem %s18_s13, 128  ;;  %p742_p4 = scmp.lt.s32.totalorder %s18_s13, %s18_s13 }
   0xb   :  { %p738_p3 = scmp.ne.s32.totalorder %s18_s13, %s737_s23  ;;  %p743_p5 = scmp.lt.s32.totalorder %s737_s23, %s737_s23 }
   0xd   :  { %p744_p6 = por %p743_p5, %p742_p4 }
   0xf   :  { %p745_p7 = pnand %p744_p6, %p738_p3 }
  0x11   :  { %748 = shalt.err (!%p745_p7)
}
  0x12   :  { %20 = dma.hbm_to_vmem [thread:$0]  %s896_s0, 128, %s18_s13, [#allocation3]  }
  0x13   :  { %s749_s28 = scalar_lea.hbm %s897_s1, 128 }
  0x14   :  { %p750_p8 = scmp.ne.s32.totalorder %s897_s1, %s749_s28  ;;  %p753_p9 = scmp.lt.u32.totalorder %s749_s28, %s897_s1 }
  0x16   :  { %p755_p10 = pnand %p753_p9, %p750_p8 }
  0x18   :  { %758 = shalt.err (!%p755_p10)
}
  0x19   :  { %s759_s6 = scalar_lea.vmem %s28_s15, 128  ;;  %p764_p12 = scmp.lt.s32.totalorder %s28_s15, %s28_s15 }
  0x1a   :  { %p760_p11 = scmp.ne.s32.totalorder %s28_s15, %s759_s6  ;;  %p765_p13 = scmp.lt.s32.totalorder %s759_s6, %s759_s6 }
  0x1c   :  { %p766_p0 = por %p765_p13, %p764_p12 }
  0x1e   :  { %p767_p1 = pnand %p766_p0, %p760_p11 }
  0x20   :  { %770 = shalt.err (!%p767_p1)
}
  0x21   :  { %30 = dma.hbm_to_vmem [thread:$0]  %s897_s1, 128, %s28_s15, [#allocation6]  }
  0x22   :  { %793 = dma.done.wait [#allocation3], 128  }
  0x23   :  { %794 = vsyncadd [#allocation3], 4294967168 }
  0x24   :  { %795 = dma.done.wait [#allocation6], 128  }
  0x25   :  { %796 = vsyncadd [#allocation6], 4294967168  ;;  %v39_v0 = vld [vmem:[#allocation2] sm:$0xff]  ;;  %v40_v1 = vld [vmem:[#allocation5] sm:$0xff]  ;;  %v801_v2 = vmov 0.0   ;;  %vm802_vm0 = vmmov 0  }
  0x26   :  { %48 = vxpose.xlu0.b32.start.end [1/1] (short) (narrow) %v39_v0, 8  ;;  %683 = vmatprep.subr.mxu0 %v801_v2  ;;  %v85_v3 = vand.u32 4294901760, %v40_v1  ;;  %vm80_vm1 = vcmask 64512   ;;  %v651_v17 = vld [vmem:[%s898_s2] ss:$0 sm:$0xff]  ;;  %s809_s2 = smov [#allocation7]  }
  0x27   :  { %685 = vmatprep.mubr.msk.f32.mxu0 %vm802_vm0, %v801_v2  ;;  %668 = vmatprep.subr.mxu1 %v801_v2  ;;  %v803_v33 = vmov 2102212464   ;;  %v804_v35 = vmov 920167782   ;;  %v805_v39 = vmov 1326507024  }
  0x28   :  { %670 = vmatprep.mubr.msk.f32.mxu1 %vm802_vm0, %v801_v2  ;;  %684 = vmatpush3.msra.mxu0 %v85_v3  ;;  %v162_v4 = vsub.f32 %v40_v1, %v85_v3  ;;  %v806_v41 = vmov 683565275   ;;  %v807_v43 = vmov 2475754826   ;;  %v808_v46 = vmov 2131351028  }
  0x29   :  { %669 = vmatpush3.msra.mxu1 %v85_v3  ;;  %688 = vmatprep.subr.mxu0 %v801_v2  ;;  %s641_s9 = sshll.u32 %s809_s2, 4  ;;  %s642_s9 = int_to_ptr.vmem [resolvable:$true] %s641_s9 }
  0x2a   :  { %673 = vmatprep.subr.mxu1 %v801_v2  ;;  %v163_v7 = vand.u32 4294901760, %v162_v4  ;;  %s771_s10 = scalar_lea.vmem %s642_s9, 128  ;;  %p776_p3 = scmp.lt.s32.totalorder %s642_s9, %s642_s9 }
  0x2b   :  { %p772_p2 = scmp.ne.s32.totalorder %s642_s9, %s771_s10  ;;  %p777_p4 = scmp.lt.s32.totalorder %s771_s10, %s771_s10 }
  0x2c   :  { %v164_v10 = vsub.f32 %v162_v4, %v163_v7 }
  0x2d   :  { %p778_p5 = por %p777_p4, %p776_p3 }
  0x2e   :  { %v165_v13 = vand.u32 4294901760, %v164_v10 }
  0x2f   :  { %p779_p6 = pnand %p778_p5, %p772_p2 }
  0xa6   :  { %v64_v5 = vpop.trf.xlu0 }
  0xa7   :  { %v82_v6 = vsel %vm80_vm1, %v64_v5, 0 }
  0xa8   :  { %v150_v8 = vand.u32 4294901760, %v82_v6 }
  0xaa   :  { %v151_v9 = vsub.f32 %v82_v6, %v150_v8 }
  0xac   :  { %v152_v11 = vand.u32 4294901760, %v151_v9 }
  0xae   :  { %686 = vmatmul.mubr.f32.vlgmr.msra.gmra.mrb[0].mxu0 %v152_v11  ;;  %v153_v12 = vsub.f32 %v151_v9, %v152_v11 }
  0xaf   :  { %689 = vmatpush3.msra.mxu0 %v163_v7  ;;  %690 = vmatprep.mubr.msk.f32.mxu0 %vm802_vm0, %v801_v2 }
  0xb0   :  { %v154_v14 = vand.u32 4294901760, %v153_v12  ;;  %693 = vmatprep.subr.mxu0 %v801_v2 }
  0xb2   :  { %671 = vmatmul.mubr.f32.vlgmr.msra.gmra.mrb[0].mxu1 %v154_v14 }
  0xb3   :  { %674 = vmatpush3.msra.mxu1 %v165_v13  ;;  %675 = vmatprep.mubr.msk.f32.mxu1 %vm802_vm0, %v801_v2 }
  0xb4   :  { %678 = vmatprep.subr.mxu1 %v801_v2 }
  0xb6   :  { %691 = vmatmul.mubr.f32.vlgmr.msra.gmra.mrb[0].mxu0 %v150_v8 }
  0xb7   :  { %694 = vmatpush3.msra.mxu0 %v85_v3  ;;  %695 = vmatprep.mubr.msk.f32.mxu0 %vm802_vm0, %v801_v2 }
  0xba   :  { %676 = vmatmul.mubr.f32.vlgmr.msra.gmra.mrb[0].mxu1 %v150_v8 }
  0xbb   :  { %679 = vmatpush3.msra.mxu1 %v162_v4  ;;  %680 = vmatprep.mubr.msk.f32.mxu1 %vm802_vm0, %v801_v2 }
  0xbe   :  { %696 = vmatmul.mubr.f32.vlgmr.msra.gmra.mrb[0].mxu0 %v150_v8 }
  0xc2   :  { %681 = vmatmul.mubr.f32.vlgmr.msra.gmra.mrb[0].mxu1 %v151_v9 }
 0x191   :  { %v526_v15 = vpop.f32.mrb[0].mxu0 }
 0x192   :  { %v697_v16 = vpop.f32.mrb[1].mxu0 }
 0x195   :  { %v306_v18 = vpop.f32.mrb[0].mxu1 }
 0x196   :  { %v698_v19 = vadd.f32 %v651_v17, %v306_v18  ;;  %v682_v20 = vpop.f32.mrb[1].mxu1 }
 0x198   :  { %v863_v21 = vadd.f32 %v698_v19, %v526_v15 }
 0x19a   :  { %v533_v22 = vand.u32 2139095040, %v863_v21  ;;  %v530_v23 = vand.u32 2147483647, %v863_v21  ;;  %vm532_vm9 = vcmp.lt.s32.totalorder %v863_v21, 0  ;;  %vm622_vm14 = vweird.f32 %v863_v21 }
 0x19c   :  { %v534_v24 = vshrl.u32 %v533_v22, 23  ;;  %v537_v26 = vand.u32 8388607, %v530_v23  ;;  %vm531_vm10 = vcmp.le.f32.partialorder %v530_v23, 0.7853982 }
 0x19e   :  { %v652_v25 = vadd.s32 4294967169, %v534_v24  ;;  %v538_v29 = vor.u32 8388608, %v537_v26 }
 0x1a0   :  { %v540_v27 = vadd.s32 1, %v652_v25  ;;  %v578_v37 = vshll.u32 %v538_v29, 8 }
 0x1a2   :  { %vm541_vm2 = vcmp.gt.s32.totalorder %v540_v27, 0 }
 0x1a3   :  { %v542_v28 = vsel %vm541_vm2, %v540_v27, 0 }
 0x1a4   :  { %v544_v30 = vand.u32 31, %v542_v28  ;;  %v543_v31 = vshrl.u32 %v542_v28, 5 }
 0x1a6   :  { %v545_v32 = vsub.s32 32, %v544_v30  ;;  %v556_v34 = vshll.u32 %v803_v33, %v544_v30  ;;  %v559_v36 = vshll.u32 %v804_v35, %v544_v30  ;;  %v547_v42 = vshll.u32 %v806_v41, %v544_v30 }
 0x1a7   :  { %v550_v45 = vshll.u32 %v807_v43, %v544_v30  ;;  %v553_v48 = vshll.u32 %v808_v46, %v544_v30  ;;  %vm565_vm3 = vcmp.lt.s32.totalorder %v543_v31, 4  ;;  %vm562_vm4 = vcmp.lt.s32.totalorder %v543_v31, 1 }
 0x1a8   :  { %v557_v38 = vshrl.u32 %v804_v35, %v545_v32  ;;  %v560_v40 = vshrl.u32 %v805_v39, %v545_v32  ;;  %v548_v44 = vshrl.u32 %v807_v43, %v545_v32  ;;  %v551_v47 = vshrl.u32 %v808_v46, %v545_v32 }
 0x1a9   :  { %v554_v49 = vshrl.u32 %v803_v33, %v545_v32  ;;  %v546_v53 = vshrl.u32 %v806_v41, %v545_v32  ;;  %vm563_vm5 = vcmp.lt.s32.totalorder %v543_v31, 2  ;;  %vm564_vm6 = vcmp.lt.s32.totalorder %v543_v31, 3 }
 0x1aa   :  { %v558_v50 = vor.u32 %v557_v38, %v556_v34  ;;  %v561_v51 = vor.u32 %v560_v40, %v559_v36  ;;  %v549_v52 = vor.u32 %v548_v44, %v547_v42  ;;  %v552_v54 = vor.u32 %v551_v47, %v550_v45 }
 0x1ab   :  { %v555_v55 = vor.u32 %v554_v49, %v553_v48 }
 0x1ac   :  { %v571_v56 = vsel %vm565_vm3, %v558_v50, 920167782  ;;  %v575_v57 = vsel %vm565_vm3, %v561_v51, 1326507024  ;;  %v570_v59 = vsel %vm562_vm4, %v549_v52, %v552_v54  ;;  %v566_v62 = vsel %vm562_vm4, %v546_v53, %v549_v52 }
 0x1ad   :  { %v567_v58 = vsel %vm565_vm3, %v555_v55, 2102212464  ;;  %v572_v60 = vsel %vm564_vm6, %v555_v55, %v571_v56  ;;  %v574_v61 = vsel %vm562_vm4, %v552_v54, %v555_v55  ;;  %v576_v1 = vsel %vm564_vm6, %v558_v50, %v575_v57 }
 0x1ae   :  { %v568_v63 = vsel %vm564_vm6, %v552_v54, %v567_v58  ;;  %v573_v0 = vsel %vm563_vm5, %v570_v59, %v572_v60  ;;  %v577_v2 = vsel %vm563_vm5, %v574_v61, %v576_v1 }
 0x1af   :  { %v869_v3 = vmul.u32.u64.low %v578_v37, %v573_v0  ;;  %v870_v4 = vmul.u32.u64.high %v578_v37, %v573_v0, %v869_v3  ;;  %v872_v5 = vmul.u32.u64.low %v578_v37, %v577_v2  ;;  %v873_v6 = vmul.u32.u64.high %v578_v37, %v577_v2, %v872_v5 }
 0x1b0   :  { %v569_v7 = vsel %vm563_vm5, %v566_v62, %v568_v63 }
 0x1b1   :  { %v588_v8 = vadd.s32 1, %v870_v4  ;;  %v585_v9 = vmul.u32 %v578_v37, %v569_v7  ;;  %vm587_vm7 = vc.u32 %v873_v6, %v869_v3  ;;  %v586_v22 = vadd.s32 %v869_v3, %v873_v6 }
 0x1b3   :  { %v589_v10 = vsel %vm587_vm7, %v588_v8, %v870_v4 }
 0x1b4   :  { %v590_v11 = vadd.s32 %v589_v10, %v585_v9 }
 0x1b6   :  { %v591_v12 = vadd.s32 536870912, %v590_v11 }
 0x1b8   :  { %v592_v13 = vshrl.u32 %v591_v12, 30 }
 0x1ba   :  { %v593_v14 = vshll.u32 %v592_v13, 30  ;;  %v616_v35 = vsub.s32 4, %v592_v13 }
 0x1bc   :  { %v594_v15 = vsub.s32 %v590_v11, %v593_v14  ;;  %v617_v38 = vsel %vm532_vm9, %v616_v35, %v592_v13 }
 0x1bd   :  { %v619_v40 = vsel %vm531_vm10, 0, %v617_v38 }
 0x1be   :  { %v596_v16 = vsub.s32 0, %v594_v15  ;;  %v623_v41 = vadd.s32 3, %v619_v40 }
 0x1c0   :  { %v653_v17 = vmin.u32 %v596_v16, %v594_v15  ;;  %v624_v42 = vand.u32 3, %v623_v41 }
 0x1c2   :  { %v598_v18 = vclz %v653_v17  ;;  %vm629_vm11 = vcmp.eq.s32.totalorder %v624_v42, 2  ;;  %vm626_vm12 = vcmp.eq.s32.totalorder %v624_v42, 0  ;;  %vm625_vm13 = vcmp.lt.s32.totalorder %v624_v42, 2 }
 0x1c4   :  { %v654_v19 = vadd.s32 4294967294, %v598_v18 }
 0x1c6   :  { %vm655_vm8 = vcmp.lt.s32.totalorder %v654_v19, 0 }
 0x1c7   :  { %v601_v20 = vsel %vm655_vm8, 0, %v654_v19 }
 0x1c8   :  { %v602_v24 = vsub.s32 32, %v601_v20  ;;  %v606_v25 = vsub.s32 4294967266, %v601_v20  ;;  %v603_v26 = vshll.u32 %v594_v15, %v601_v20 }
 0x1ca   :  { %v604_v27 = vshrl.u32 %v586_v22, %v602_v24  ;;  %v607_v28 = vadd.s32 127, %v606_v25 }
 0x1cc   :  { %v605_v29 = vor.u32 %v604_v27, %v603_v26  ;;  %v608_v30 = vshll.u32 %v607_v28, 23 }
 0x1ce   :  { %v609_v31 = vor.u32 4788187, %v608_v30  ;;  %v612_v33 = vcvt.s32.f32 %v605_v29 }
 0x1d0   :  { %v610_v32 = vand.u32 2147483647, %v609_v31 }
 0x1d2   :  { %v613_v34 = vmul.f32 %v612_v33, %v610_v32 }
 0x1d4   :  { %v614_v36 = vxor.u32 2147483648, %v613_v34 }
 0x1d6   :  { %v615_v37 = vsel %vm532_vm9, %v614_v36, %v613_v34 }
 0x1d7   :  { %v618_v39 = vsel %vm531_vm10, %v863_v21, %v615_v37 }
 0x1d8   :  { %723 = vcosq.f32 %v618_v39 }
 0x1d9   :  { %725 = vsinq.f32 %v618_v39 }
 0x1e2   :  { %v724_v43 = vpop.eup %723 }
 0x1e3   :  { %v726_v44 = vpop.eup %725  ;;  %v630_v45 = vxor.u32 2147483648, %v724_v43 }
 0x1e4   :  { %v627_v46 = vxor.u32 2147483648, %v726_v44 }
 0x1e5   :  { %v631_v47 = vsel %vm629_vm11, %v630_v45, %v726_v44 }
 0x1e6   :  { %v628_v23 = vsel %vm626_vm12, %v724_v43, %v627_v46 }
 0x1e7   :  { %v632_v48 = vsel %vm625_vm13, %v628_v23, %v631_v47 }
 0x1e8   :  { %v633_v49 = vsel %vm622_vm14, nan, %v632_v48 }
 0x1e9   :  { %634 = vst [vmem:[#allocation7] sm:$0xff] %v633_v49 }
 0x1ea   :  { %782 = shalt.err (!%p779_p6)
}
 0x1eb   :  { %s783_s13 = scalar_lea.hbm %s899_s3, 128 }
 0x1ec   :  { %p784_p7 = scmp.ne.s32.totalorder %s899_s3, %s783_s13  ;;  %p787_p8 = scmp.lt.u32.totalorder %s783_s13, %s899_s3 }
 0x1ee   :  { %p789_p9 = pnand %p787_p8, %p784_p7 }
 0x1f0   :  { %792 = shalt.err (!%p789_p9)
}
 0x1f1   :  { %644 = dma.vmem_to_hbm [thread:$0]  %s642_s9, 128, %s899_s3, [#allocation4]  }
 0x1f2   :  { %797 = dma.done.wait [#allocation4], 128  }
 0x1f3   :  { %798 = vsyncadd [#allocation4], 4294967168 }
 0x1f4   :  { %648 = vsyncpa [#allocation3], 1 }
 0x1f5   :  { %649 = vsyncpa [#allocation6], 1 }
 0x1f6   :  { %650 = vsyncpa [#allocation4], 1 }

</bundles_post_ra>
